<compile_context>
chip_gen: v7x
topology: tpu7x:2x2x1
jax: 0.10.0
libtpu: 0.0.40
codegen_flags: <defaults>
</compile_context>

<pallas_src>
import math

import jax
import jax.numpy as jnp
from jax.scipy.linalg import block_diag
from jax.experimental import pallas as pl
from jax.experimental.pallas import tpu as pltpu

SQRT_2PI = math.sqrt(2.0 * math.pi)
LOG3 = math.log(3.0)
LANE = 128


def _round_up(v, m):
    return (v + m - 1) // m * m


# ----------------------------- fused Pallas kernel ---------------------------

def _make_fused_kernel(n_layers, G, N, want_prior):
    """Build the fused forward kernel for a fixed layer count / graph size."""

    def kernel(mats_ref, sigw_ref, alpha_ref, x_ref, w_ref, *out_refs):
        h_out_ref = out_refs[0]                     # (N, Kpad) f32, lane-dense

        # ---------------- STS prior (float32, exact divisions) ---------------
        sigw = sigw_ref[...]                                     # (G, 1, N)
        sig = 1.0 / (1.0 + jnp.exp(-5.0 * sigw)) + 1e-5          # sigmoid(5w)+1e-5
        sig = jnp.exp(sig * LOG3) - 1.0                          # 3**sigma - 1

        m = mats_ref[...]                                        # (G, N, N)
        p = jnp.exp(-m / (2.0 * sig * sig)) / (SQRT_2PI * sig)   # Gaussian kernel

        # mask = (matrices == 0), except positions [g, i, i] for i < G are kept
        # (faithfully reproduces generate_mask's use of n_graph, not N).
        row = jax.lax.broadcasted_iota(jnp.int32, (N, N), 0)
        col = jax.lax.broadcasted_iota(jnp.int32, (N, N), 1)
        diag_keep = (row == col) & (row < G)                     # (N, N) bool
        mask = (m == 0.0) & jnp.logical_not(diag_keep)[None, :, :]
        p = jnp.where(mask, 0.0, p)

        p = p / (jnp.sum(p, axis=1, keepdims=True) + 1e-8)       # column norm

        a = alpha_ref[...]                                       # (1, G)
        a = a - jnp.max(a, axis=-1, keepdims=True)
        ea = jnp.exp(a)
        aw = ea / jnp.sum(ea, axis=-1, keepdims=True)            # softmax(alpha)
        prior = jnp.sum(p * aw.reshape(G, 1, 1), axis=0)         # (N, N) f32
        if want_prior:
            out_refs[1][...] = prior

        # ------------- GCN layers (all f32 at these toy shapes) --------------
        # h stays lane-packed & padded: (N, Kpad).  Zero padding lanes stay
        # zero through prior@h, the zero-padded block-diag weight, and relu.
        h = x_ref[...]
        for li in range(n_layers):
            wx = jnp.dot(prior, h, preferred_element_type=jnp.float32)
            y = jnp.dot(wx, w_ref[li], preferred_element_type=jnp.float32)
            h = jnp.maximum(y, 0.0)                              # relu
        h_out_ref[...] = h                                       # lane-dense store

    return kernel


# ------------------------------ wrapper ---------------------------------------

def multiple_gcn_forward(x, matrices, sigma_w, alpha, lin_ws, *, return_prior=True):
    """x: (B, N, Cin) f32; lin_ws: list of (Cout, Cin_l) f32 (PyTorch layout)."""
    B, N, Cin = x.shape
    G = matrices.shape[0]
    n_layers = len(lin_ws)
    assert n_layers >= 1
    Cout = lin_ws[0].shape[0]

    Kin = B * Cin
    Kout = B * Cout
    Kpad = _round_up(max(Kin, Kout), LANE)           # lane-dense packed width

    # Lane-pack the batch: (B, N, C) -> (N, B*C), zero-padded to Kpad lanes.
    x_packed = jnp.transpose(x, (1, 0, 2)).reshape(N, Kin)
    x_packed = jnp.pad(x_packed, ((0, 0), (0, Kpad - Kin)))

    # Per-batch nn.Linear as one lane-dense matmul: block-diagonal W^T, all
    # layers stacked into one zero-padded (n_layers, Kpad, Kpad) array so the
    # kernel sees a single weight input (one DMA stream).
    # NOTE: O(B^2) trick -- fine for small B; see scaling notes at the top.
    w_stack = jnp.zeros((n_layers, Kpad, Kpad), jnp.float32)
    for li, w in enumerate(lin_ws):
        wt_bd = block_diag(*([w.T] * B)).astype(jnp.float32)     # (B*Cin_l, B*Cout)
        k_in, k_out = wt_bd.shape
        w_stack = w_stack.at[li, :k_in, :k_out].set(wt_bd)

    kernel = _make_fused_kernel(n_layers, G, N, return_prior)

    out_shape = [jax.ShapeDtypeStruct((N, Kpad), jnp.float32)]   # lane-packed h
    if return_prior:
        out_shape.append(jax.ShapeDtypeStruct((N, N), jnp.float32))

    outs = pl.pallas_call(
        kernel,
        out_shape=tuple(out_shape),
        in_specs=[pl.BlockSpec(memory_space=pltpu.MemorySpace.VMEM)] * 5,
        out_specs=tuple(
            [pl.BlockSpec(memory_space=pltpu.MemorySpace.VMEM)] * len(out_shape)
        ),
    )(matrices, sigma_w, alpha, x_packed, w_stack)

    h_packed = outs[0]
    h = jnp.transpose(h_packed[:, :Kout].reshape(N, B, Cout), (1, 0, 2))
    if return_prior:
        return h, outs[1]
    return h


# ------------------------- parameter / input setup ----------------------------

def init_params(key, G, N, Cin, Cout, n_layers):
    keys = jax.random.split(key, 1 + n_layers)
    # nn.Linear(n_graph, N).weight has shape (N, G); STS reshapes it to (G,1,N).
    bound = 1.0 / math.sqrt(G)
    sigma_lin_w = jax.random.uniform(keys[0], (N, G), jnp.float32, -bound, bound)
    sigma_w = sigma_lin_w.reshape(G, 1, N)
    alpha = jnp.ones((1, G), jnp.float32) / G                    # Parameter(ones/G)
    lin_ws = []
    cin = Cin
    for i in range(n_layers):
        b = 1.0 / math.sqrt(cin)
        lin_ws.append(jax.random.uniform(keys[1 + i], (Cout, cin),
                                         jnp.float32, -b, b))
        cin = Cout
    # NOTE: the PyTorch module allocates n_layers+1 Linears but forward() only
    # ever uses the first n_layers; the unused extra one is not created here.
    return sigma_w, alpha, lin_ws


# ------------------------------ pure-JAX reference ----------------------------

def reference(matrices, sigma_w, alpha, lin_ws, x):
    G = matrices.shape[0]
    hp = jax.lax.Precision.HIGHEST
    sig = jax.nn.sigmoid(sigma_w * 5.0) + 1e-5
    sig = jnp.power(3.0, sig) - 1.0
    p = jnp.exp(-matrices / (2.0 * sig ** 2)) / (SQRT_2PI * sig)
    mask = (matrices == 0.0)
    idx = jnp.arange(G)
    mask = mask.at[:, idx, idx].set(False)                       # original quirk
    p = jnp.where(mask, 0.0, p)
    p = p / (p.sum(1, keepdims=True) + 1e-8)
    w = jax.nn.softmax(alpha[0], axis=0)
    prior = jnp.einsum('gij,g->ij', p, w, precision=hp)
    h = x
    for wl in lin_ws:
        wx = jnp.einsum('ij,bjc->bic', prior, h, precision=hp)
        h = jax.nn.relu(jnp.einsum('bic,oc->bio', wx, wl, precision=hp))
    return h, prior


# ------------------------------------ main -------------------------------------

if __name__ == "__main__":
    key = jax.random.PRNGKey(0)
    G, N, B, Cin, Cout, n_layers = 3, 16, 2, 4, 32, 2

    km, kz, kx, kp = jax.random.split(key, 4)
    mats = jax.random.uniform(km, (G, N, N), jnp.float32, 0.0, 2.0)
    # sprinkle exact zeros so the mask path is exercised
    mats = jnp.where(jax.random.uniform(kz, (G, N, N)) < 0.3, 0.0, mats)
    sigma_w, alpha, lin_ws = init_params(kp, G, N, Cin, Cout, n_layers)
    x = jax.random.normal(kx, (B, N, Cin), jnp.float32)

    fwd = jax.jit(multiple_gcn_forward, static_argnames=("return_prior",))
    h, prior = fwd(x, mats, sigma_w, alpha, lin_ws)
    h = jax.block_until_ready(h)
    prior = jax.block_until_ready(prior)

    h_ref, prior_ref = reference(mats, sigma_w, alpha, lin_ws, x)
    assert h.shape == (B, N, Cout) and prior.shape == (N, N)
    # Prior math is fully f32 with exact divisions -> tight tolerance.
    assert jnp.allclose(prior, prior_ref, atol=1e-4, rtol=1e-4)
    # GCN matmuls run with f32 operands / f32 accumulation; modest slack for
    # MXU pass decomposition differences vs the HIGHEST-precision reference.
    assert jnp.allclose(h, h_ref, atol=2e-2, rtol=2e-2)
    print("KERNEL_OK")
</pallas_src>

<mosaic_0001>
module attributes {stable_mosaic.version = 11 : i64} {
  func.func @kernel(%arg0: memref<3x16x16xf32, #tpu.memory_space<vmem>>, %arg1: memref<3x1x16xf32, #tpu.memory_space<vmem>>, %arg2: memref<1x3xf32, #tpu.memory_space<vmem>>, %arg3: memref<16x128xf32, #tpu.memory_space<vmem>>, %arg4: memref<2x128x128xf32, #tpu.memory_space<vmem>>, %arg5: memref<16x128xf32, #tpu.memory_space<vmem>>, %arg6: memref<16x16xf32, #tpu.memory_space<vmem>>) attributes {dimension_semantics = [], scalar_prefetch = 0 : i64, scratch_operands = 0 : i64, tpu.core_type = #tpu.core_type<tc>} {
    %c0 = arith.constant 0 : index
    %c0_0 = arith.constant 0 : index
    %c0_1 = arith.constant 0 : index
    %0 = vector.load %arg1[%c0, %c0_0, %c0_1] : memref<3x1x16xf32, #tpu.memory_space<vmem>>, vector<3x1x16xf32>
    %cst = arith.constant -5.000000e+00 : f32
    %1 = vector.broadcast %cst : f32 to vector<3x1x16xf32>
    %2 = arith.mulf %1, %0 : vector<3x1x16xf32>
    %3 = math.exp %2 : vector<3x1x16xf32>
    %cst_2 = arith.constant 1.000000e+00 : f32
    %4 = vector.broadcast %cst_2 : f32 to vector<3x1x16xf32>
    %5 = arith.addf %4, %3 : vector<3x1x16xf32>
    %cst_3 = arith.constant 1.000000e+00 : f32
    %6 = vector.broadcast %cst_3 : f32 to vector<3x1x16xf32>
    %7 = arith.divf %6, %5 : vector<3x1x16xf32>
    %cst_4 = arith.constant 9.99999974E-6 : f32
    %8 = vector.broadcast %cst_4 : f32 to vector<3x1x16xf32>
    %9 = arith.addf %7, %8 : vector<3x1x16xf32>
    %cst_5 = arith.constant 1.09861231 : f32
    %10 = vector.broadcast %cst_5 : f32 to vector<3x1x16xf32>
    %11 = arith.mulf %9, %10 : vector<3x1x16xf32>
    %12 = math.exp %11 : vector<3x1x16xf32>
    %cst_6 = arith.constant 1.000000e+00 : f32
    %13 = vector.broadcast %cst_6 : f32 to vector<3x1x16xf32>
    %14 = arith.subf %12, %13 : vector<3x1x16xf32>
    %c0_7 = arith.constant 0 : index
    %c0_8 = arith.constant 0 : index
    %c0_9 = arith.constant 0 : index
    %15 = vector.load %arg0[%c0_7, %c0_8, %c0_9] : memref<3x16x16xf32, #tpu.memory_space<vmem>>, vector<3x16x16xf32>
    %cst_10 = arith.constant 0.000000e+00 : f32
    %16 = vector.broadcast %cst_10 : f32 to vector<3x16x16xf32>
    %17 = arith.subf %16, %15 : vector<3x16x16xf32>
    %cst_11 = arith.constant 2.000000e+00 : f32
    %18 = vector.broadcast %cst_11 : f32 to vector<3x1x16xf32>
    %19 = arith.mulf %18, %14 : vector<3x1x16xf32>
    %20 = arith.mulf %19, %14 : vector<3x1x16xf32>
    %21 = vector.broadcast %20 : vector<3x1x16xf32> to vector<3x16x16xf32>
    %22 = arith.divf %17, %21 : vector<3x16x16xf32>
    %23 = math.exp %22 : vector<3x16x16xf32>
    %cst_12 = arith.constant 2.50662827 : f32
    %24 = vector.broadcast %cst_12 : f32 to vector<3x1x16xf32>
    %25 = arith.mulf %24, %14 : vector<3x1x16xf32>
    %26 = vector.broadcast %25 : vector<3x1x16xf32> to vector<3x16x16xf32>
    %27 = arith.divf %23, %26 : vector<3x16x16xf32>
    %28 = tpu.iota {dimensions = array<i32: 0>} : vector<16x16xi32>
    %29 = tpu.iota {dimensions = array<i32: 1>} : vector<16x16xi32>
    %30 = arith.cmpi eq, %28, %29 : vector<16x16xi32>
    %c3_i32 = arith.constant 3 : i32
    %31 = vector.broadcast %c3_i32 : i32 to vector<16x16xi32>
    %32 = arith.cmpi slt, %28, %31 : vector<16x16xi32>
    %33 = arith.andi %30, %32 : vector<16x16xi1>
    %cst_13 = arith.constant 0.000000e+00 : f32
    %34 = vector.broadcast %cst_13 : f32 to vector<3x16x16xf32>
    %35 = arith.cmpf oeq, %15, %34 : vector<3x16x16xf32>
    %cst_14 = arith.constant dense<true> : vector<16x16xi1>
    %36 = arith.xori %33, %cst_14 : vector<16x16xi1>
    %37 = vector.shape_cast %36 : vector<16x16xi1> to vector<1x16x16xi1>
    %38 = vector.broadcast %37 : vector<1x16x16xi1> to vector<3x16x16xi1>
    %39 = arith.andi %35, %38 : vector<3x16x16xi1>
    %cst_15 = arith.constant 0.000000e+00 : f32
    %40 = vector.broadcast %cst_15 : f32 to vector<3x16x16xf32>
    %41 = arith.select %39, %40, %27 : vector<3x16x16xi1>, vector<3x16x16xf32>
    %cst_16 = arith.constant dense<0.000000e+00> : vector<3x16xf32>
    %42 = vector.multi_reduction <add>, %41, %cst_16 [1] : vector<3x16x16xf32> to vector<3x16xf32>
    %43 = vector.shape_cast %42 : vector<3x16xf32> to vector<3x1x16xf32>
    %cst_17 = arith.constant 9.99999993E-9 : f32
    %44 = vector.broadcast %cst_17 : f32 to vector<3x1x16xf32>
    %45 = arith.addf %43, %44 : vector<3x1x16xf32>
    %46 = vector.broadcast %45 : vector<3x1x16xf32> to vector<3x16x16xf32>
    %47 = arith.divf %41, %46 : vector<3x16x16xf32>
    %c0_18 = arith.constant 0 : index
    %c0_19 = arith.constant 0 : index
    %48 = vector.load %arg2[%c0_18, %c0_19] : memref<1x3xf32, #tpu.memory_space<vmem>>, vector<1x3xf32>
    %cst_20 = arith.constant dense<0xFF800000> : vector<1xf32>
    %49 = vector.multi_reduction <maximumf>, %48, %cst_20 [1] : vector<1x3xf32> to vector<1xf32>
    %50 = vector.shape_cast %49 : vector<1xf32> to vector<1x1xf32>
    %51 = vector.broadcast %50 : vector<1x1xf32> to vector<1x3xf32>
    %52 = arith.subf %48, %51 : vector<1x3xf32>
    %53 = math.exp %52 : vector<1x3xf32>
    %cst_21 = arith.constant dense<0.000000e+00> : vector<1xf32>
    %54 = vector.multi_reduction <add>, %53, %cst_21 [1] : vector<1x3xf32> to vector<1xf32>
    %55 = vector.shape_cast %54 : vector<1xf32> to vector<1x1xf32>
    %56 = vector.broadcast %55 : vector<1x1xf32> to vector<1x3xf32>
    %57 = arith.divf %53, %56 : vector<1x3xf32>
    %58 = vector.shape_cast %57 : vector<1x3xf32> to vector<3x1x1xf32>
    %59 = vector.broadcast %58 : vector<3x1x1xf32> to vector<3x16x16xf32>
    %60 = arith.mulf %47, %59 : vector<3x16x16xf32>
    %cst_22 = arith.constant dense<0.000000e+00> : vector<16x16xf32>
    %61 = vector.multi_reduction <add>, %60, %cst_22 [0] : vector<3x16x16xf32> to vector<16x16xf32>
    %c0_23 = arith.constant 0 : index
    %c0_24 = arith.constant 0 : index
    %62 = vector.load %arg6[%c0_23, %c0_24] : memref<16x16xf32, #tpu.memory_space<vmem>>, vector<16x16xf32>
    tpu.vector_store %arg6[%c0_23, %c0_24], %61 {strides = array<i32>} : memref<16x16xf32, #tpu.memory_space<vmem>>, vector<16x16xf32>,
    %c0_25 = arith.constant 0 : index
    %c0_26 = arith.constant 0 : index
    %63 = vector.load %arg3[%c0_25, %c0_26] : memref<16x128xf32, #tpu.memory_space<vmem>>, vector<16x128xf32>
    %cst_27 = arith.constant dense<0.000000e+00> : vector<16x128xf32>
    %64 = tpu.matmul %61, %63, %cst_27 {dimension_numbers = #tpu.dot_dimension_numbers<[1], [0], [0], [1], [0, 0, 1, 1], [], []>} : vector<16x16xf32>, vector<16x128xf32>, vector<16x128xf32> -> vector<16x128xf32>
    %c0_28 = arith.constant 0 : index
    %c0_29 = arith.constant 0 : index
    %c0_30 = arith.constant 0 : index
    %65 = vector.load %arg4[%c0_28, %c0_29, %c0_30] : memref<2x128x128xf32, #tpu.memory_space<vmem>>, vector<1x128x128xf32>
    %66 = vector.shape_cast %65 : vector<1x128x128xf32> to vector<128x128xf32>
    %cst_31 = arith.constant dense<0.000000e+00> : vector<16x128xf32>
    %67 = tpu.matmul %64, %66, %cst_31 {dimension_numbers = #tpu.dot_dimension_numbers<[1], [0], [0], [1], [0, 0, 1, 1], [], []>} : vector<16x128xf32>, vector<128x128xf32>, vector<16x128xf32> -> vector<16x128xf32>
    %cst_32 = arith.constant 0.000000e+00 : f32
    %68 = vector.broadcast %cst_32 : f32 to vector<16x128xf32>
    %69 = arith.maximumf %67, %68 : vector<16x128xf32>
    %cst_33 = arith.constant dense<0.000000e+00> : vector<16x128xf32>
    %70 = tpu.matmul %61, %69, %cst_33 {dimension_numbers = #tpu.dot_dimension_numbers<[1], [0], [0], [1], [0, 0, 1, 1], [], []>} : vector<16x16xf32>, vector<16x128xf32>, vector<16x128xf32> -> vector<16x128xf32>
    %c1 = arith.constant 1 : index
    %c0_34 = arith.constant 0 : index
    %c0_35 = arith.constant 0 : index
    %71 = vector.load %arg4[%c1, %c0_34, %c0_35] : memref<2x128x128xf32, #tpu.memory_space<vmem>>, vector<1x128x128xf32>
    %72 = vector.shape_cast %71 : vector<1x128x128xf32> to vector<128x128xf32>
    %cst_36 = arith.constant dense<0.000000e+00> : vector<16x128xf32>
    %73 = tpu.matmul %70, %72, %cst_36 {dimension_numbers = #tpu.dot_dimension_numbers<[1], [0], [0], [1], [0, 0, 1, 1], [], []>} : vector<16x128xf32>, vector<128x128xf32>, vector<16x128xf32> -> vector<16x128xf32>
    %cst_37 = arith.constant 0.000000e+00 : f32
    %74 = vector.broadcast %cst_37 : f32 to vector<16x128xf32>
    %75 = arith.maximumf %73, %74 : vector<16x128xf32>
    %c0_38 = arith.constant 0 : index
    %c0_39 = arith.constant 0 : index
    %76 = vector.load %arg5[%c0_38, %c0_39] : memref<16x128xf32, #tpu.memory_space<vmem>>, vector<16x128xf32>
    tpu.vector_store %arg5[%c0_38, %c0_39], %75 {strides = array<i32>} : memref<16x128xf32, #tpu.memory_space<vmem>>, vector<16x128xf32>,
    return
  }
}

</mosaic_0001>

<bundles_post_ra>
// kernel: multiple_gcn_forward.1
= control target key start
LH: loop header
LB: loop body
LE: loop exit
PB: predicated region body
PF: predicated region fallthrough
CT: control target
= control target key end

     0   :  { %vm222_vm0 = vcmask 16384   ;;  %s1201_s0 = inlined_call_operand.vmem [shape: f32[3,16,16], index: 0, kind: input, shape index: {}]   ;;  %s1202_s1 = inlined_call_operand.vmem [shape: f32[3,1,16], index: 1, kind: input, shape index: {}]   ;;  %s1203_s2 = inlined_call_operand.vmem [shape: f32[1,3], index: 2, kind: input, shape index: {}]   ;;  %s1204_s3 = inlined_call_operand.vmem [shape: f32[16,128], index: 3, kind: input, shape index: {}]   ;;  %s1205_s4 = inlined_call_operand.vmem [shape: f32[2,128,128], index: 4, kind: input, shape index: {}]   ;;  %s1206_s5 = inlined_call_operand.vmem [shape: f32[16,128], index: 5, kind: output, shape index: {0}]   ;;  %s1207_s6 = inlined_call_operand.hbm [shape: f32[16,16], index: 6, kind: output, shape index: {1}]  }
   0x1   :  { %v221_v0 = vld [vmem:[%s1203_s2] sm:$0x1] }
   0x2   :  { %12 = vsyncpa [#allocation3], 0  ;;  %v223_v1 = vsel %vm222_vm0, %v221_v0, -inf  ;;  %v80_v7 = vlaneseq  ;;  %v23_v11 = vld [vmem:[%s1202_s1] sm:$0x1]  ;;  %v272_v40 = vld [vmem:[%s1204_s3 + $0x8] sm:$0xff] }
   0x3   :  { %224 = vmax.xlane.f32.xlu0 %v223_v1  ;;  %v24_v12 = vld [vmem:[%s1202_s1 + $0x1] sm:$0x1]  ;;  %v26_v13 = vmul.f32 -5.0, %v23_v11  ;;  %v25_v14 = vld [vmem:[%s1202_s1 + $0x2] sm:$0x1]  ;;  %v355_v46 = vld [vmem:[%s1205_s4 + $0x8] sm:$0xff] }
   0x4   :  { %v983_v8 = vshrl.u32 %v80_v7, 7  ;;  %v150_v9 = vand.u32 127, %v80_v7  ;;  %v27_v15 = vmul.f32 -5.0, %v24_v12  ;;  %v28_v16 = vmul.f32 -5.0, %v25_v14  ;;  %v271_v39 = vld [vmem:[%s1204_s3] sm:$0xff]  ;;  %v1028_v1 = vld [vmem:[%s1201_s0 + $0x8] sm:$0xff] }
   0x5   :  { %v29_v17 = vmul.f32 1.442695, %v26_v13  ;;  %v789_v41 = vpack.c.bf16 %v272_v40, %v271_v39  ;;  %v354_v45 = vld [vmem:[%s1205_s4] sm:$0xff]  ;;  %v66_v7 = vsub.f32 0.0, %v1028_v1  ;;  %vm941_vm4 = vmmov 1   ;;  %s942_s24 = smov [#allocation2]  }
   0x6   :  { %vm153_vm1 = vcmp.lt.s32.totalorder %v983_v8, 3  ;;  %vm151_vm2 = vcmp.eq.s32.totalorder %v983_v8, %v150_v9  ;;  %v31_v18 = vmul.f32 1.442695, %v27_v15  ;;  %v33_v19 = vmul.f32 1.442695, %v28_v16  ;;  %v1047_v9 = vld [vmem:[%s1201_s0 + $0x28] sm:$0xff] }
   0x7   :  { %vm987_vm3 = vmand %vm151_vm2, %vm153_vm1  ;;  %v1007_v42 = vsub.s32 0, %v983_v8  ;;  %790 = vmatprep.subr.bf16.mxu1 %v789_v41  ;;  %v1016_v49 = vpack.c.bf16 %v355_v46, %v354_v45  ;;  %vm158_vm9 = vcmp.eq.f32.partialorder %v1028_v1, 0.0  ;;  %vm162_vm13 = vcmp.eq.f32.partialorder %v1047_v9, 0.0  ;;  %s625_s25 = sshll.u32 %s942_s24, 4  ;;  %s626_s25 = int_to_ptr.vmem [resolvable:$true] %s625_s25 }
   0x8   :  { %792 = vmatpush3.bf16.msra.mxu1 %v789_v41  ;;  %vm1057_vm5 = vmxor %vm987_vm3, %vm941_vm4  ;;  %vm181_vm15 = vcmask 130048   ;;  %s917_s26 = scalar_lea.vmem %s626_s25, 256  ;;  %p922_p1 = scmp.lt.s32.totalorder %s626_s25, %s626_s25 }
   0x9   :  { %794 = vmatprep.subr.bf16.mxu1 %v1016_v49  ;;  %p918_p0 = scmp.ne.s32.totalorder %s626_s25, %s917_s26  ;;  %p923_p2 = scmp.lt.s32.totalorder %s917_s26, %s917_s26 }
   0xb   :  { %p924_p3 = por %p923_p2, %p922_p1 }
   0xd   :  { %p925_p4 = pnand %p924_p3, %p918_p0 }
  0x90   :  { %v225_v2 = vpop.xlane.xlu0 %224 }
  0x91   :  { %v226_v3 = vsub.f32 %v221_v0, %v225_v2  ;;  %v59_v0 = vld [vmem:[%s1201_s0] sm:$0xff]  ;;  %v1033_v2 = vld [vmem:[%s1201_s0 + $0x10] sm:$0xff] }
  0x92   :  { %v67_v11 = vsub.f32 0.0, %v1033_v2  ;;  %vm157_vm6 = vcmp.eq.f32.partialorder %v59_v0, 0.0  ;;  %vm159_vm7 = vcmp.eq.f32.partialorder %v1033_v2, 0.0 }
  0x93   :  { %v227_v4 = vmul.f32 1.442695, %v226_v3  ;;  %v1038_v3 = vld [vmem:[%s1201_s0 + $0x18] sm:$0xff]  ;;  %vm169_vm10 = vmand %vm157_vm6, %vm1057_vm5 }
  0x94   :  { %v68_v13 = vsub.f32 0.0, %v1038_v3  ;;  %vm160_vm11 = vcmp.eq.f32.partialorder %v1038_v3, 0.0  ;;  %vm171_vm12 = vmand %vm159_vm7, %vm1057_vm5 }
  0x95   :  { %865 = vpow2.f32 %v227_v4  ;;  %v65_v4 = vsub.f32 0.0, %v59_v0 }
  0x96   :  { %867 = vpow2.f32 %v29_v17  ;;  %v70_v17 = vsub.f32 0.0, %v1047_v9 }
  0x97   :  { %869 = vpow2.f32 %v31_v18 }
  0x98   :  { %871 = vpow2.f32 %v33_v19 }
  0x9f   :  { %v866_v5 = vpop.eup %865 }
  0xa0   :  { %v229_v6 = vsel %vm222_vm0, %v866_v5, 0.0  ;;  %v868_v20 = vpop.eup %867 }
  0xa1   :  { %230 = vadd.xlane.f32.xlu0 %v229_v6  ;;  %v870_v21 = vpop.eup %869  ;;  %v35_v22 = vadd.f32 1.0, %v868_v20  ;;  %v63_v6 = vld [vmem:[%s1201_s0 + $0x20] sm:$0xff] }
  0xa2   :  { %v872_v23 = vpop.eup %871  ;;  %v36_v24 = vadd.f32 1.0, %v870_v21  ;;  %v69_v14 = vsub.f32 0.0, %v63_v6  ;;  %vm161_vm8 = vcmp.eq.f32.partialorder %v63_v6, 0.0 }
  0xa3   :  { %v37_v25 = vadd.f32 1.0, %v872_v23  ;;  %873 = vrcp.f32 %v35_v22  ;;  %vm173_vm14 = vmand %vm161_vm8, %vm1057_vm5 }
  0xa4   :  { %875 = vrcp.f32 %v36_v24 }
  0xa5   :  { %877 = vrcp.f32 %v37_v25 }
  0xad   :  { %v874_v26 = vpop.eup %873 }
  0xae   :  { %v876_v27 = vpop.eup %875  ;;  %v44_v28 = vadd.f32 1e-05, %v874_v26 }
  0xaf   :  { %v878_v29 = vpop.eup %877  ;;  %v45_v30 = vadd.f32 1e-05, %v876_v27 }
  0xb0   :  { %v46_v31 = vadd.f32 1e-05, %v878_v29  ;;  %v47_v32 = vmul.f32 1.0986123, %v44_v28 }
  0xb1   :  { %v48_v33 = vmul.f32 1.0986123, %v45_v30 }
  0xb2   :  { %v49_v35 = vmul.f32 1.0986123, %v46_v31  ;;  %v50_v36 = vmul.f32 1.442695, %v47_v32 }
  0xb3   :  { %v52_v37 = vmul.f32 1.442695, %v48_v33 }
  0xb4   :  { %v54_v38 = vmul.f32 1.442695, %v49_v35 }
 0x12e   :  { %v231_v34 = vpop.xlane.xlu0 %230 }
 0x12f   :  { %879 = vrcp.f32 %v231_v34 }
 0x130   :  { %881 = vpow2.f32 %v50_v36 }
 0x131   :  { %883 = vpow2.f32 %v52_v37 }
 0x132   :  { %885 = vpow2.f32 %v54_v38 }
 0x139   :  { %v880_v43 = vpop.eup %879 }
 0x13a   :  { %v233_v44 = vmul.f32 %v880_v43, %v866_v5  ;;  %v882_v47 = vpop.eup %881 }
 0x13b   :  { %v884_v50 = vpop.eup %883  ;;  %v638_v51 = vadd.f32 -1.0, %v882_v47 }
 0x13c   :  { %v237_v48 = vrot.slane %v233_v44, %v1007_v42  ;;  %v886_v52 = vpop.eup %885  ;;  %v639_v53 = vadd.f32 -1.0, %v884_v50 }
 0x13d   :  { %v640_v54 = vadd.f32 -1.0, %v886_v52  ;;  %v71_v55 = vmul.f32 2.0, %v638_v51  ;;  %v116_v26 = vmul.f32 2.5066283, %v638_v51 }
 0x13e   :  { %239 = vbcast.lane.b32.xlu1 %v237_v48, 256  ;;  %v72_v56 = vmul.f32 2.0, %v639_v53  ;;  %v117_v28 = vmul.f32 2.5066283, %v639_v53 }
 0x13f   :  { %v73_v57 = vmul.f32 2.0, %v640_v54  ;;  %v74_v58 = vmul.f32 %v638_v51, %v71_v55  ;;  %v118_v30 = vmul.f32 2.5066283, %v640_v54  ;;  %v125_v32 = vrot.slane %v116_v26, %v1007_v42 }
 0x140   :  { %v75_v59 = vmul.f32 %v639_v53, %v72_v56  ;;  %v129_v33 = vrot.slane %v117_v28, %v1007_v42 }
 0x141   :  { %v76_v60 = vmul.f32 %v640_v54, %v73_v57  ;;  %v83_v61 = vrot.slane %v74_v58, %v1007_v42  ;;  %v133_v34 = vrot.slane %v118_v30, %v1007_v42  ;;  %v251_v30 = vsub.s32 2, %v983_v8 }
 0x142   :  { %v87_v62 = vrot.slane %v75_v59, %v1007_v42 }
 0x143   :  { %v91_v63 = vrot.slane %v76_v60, %v1007_v42  ;;  %887 = vrcp.f32 %v83_v61 }
 0x144   :  { %889 = vrcp.f32 %v87_v62 }
 0x145   :  { %891 = vrcp.f32 %v91_v63 }
 0x14d   :  { %v888_v5 = vpop.eup %887 }
 0x14e   :  { %v890_v12 = vpop.eup %889  ;;  %v96_v15 = vmul.f32 %v888_v5, %v65_v4  ;;  %v97_v18 = vmul.f32 %v888_v5, %v66_v7 }
 0x14f   :  { %v892_v16 = vpop.eup %891  ;;  %v99_v19 = vmul.f32 %v890_v12, %v67_v11  ;;  %v100_v20 = vmul.f32 %v890_v12, %v68_v13 }
 0x150   :  { %v102_v21 = vmul.f32 %v892_v16, %v69_v14  ;;  %v104_v22 = vmul.f32 1.442695, %v96_v15  ;;  %v103_v23 = vmul.f32 %v892_v16, %v70_v17  ;;  %v106_v24 = vmul.f32 1.442695, %v97_v18 }
 0x151   :  { %v108_v25 = vmul.f32 1.442695, %v99_v19  ;;  %v110_v27 = vmul.f32 1.442695, %v100_v20 }
 0x152   :  { %893 = vpow2.f32 %v104_v22  ;;  %v112_v29 = vmul.f32 1.442695, %v102_v21  ;;  %v114_v31 = vmul.f32 1.442695, %v103_v23 }
 0x153   :  { %895 = vpow2.f32 %v106_v24 }
 0x154   :  { %897 = vpow2.f32 %v108_v25 }
 0x155   :  { %899 = vpow2.f32 %v110_v27 }
 0x156   :  { %901 = vpow2.f32 %v112_v29  ;;  %v247_v29 = vsub.s32 1, %v983_v8 }
 0x157   :  { %903 = vpow2.f32 %v114_v31 }
 0x158   :  { %905 = vrcp.f32 %v125_v32 }
 0x159   :  { %907 = vrcp.f32 %v129_v33 }
 0x15a   :  { %909 = vrcp.f32 %v133_v34 }
 0x15c   :  { %v894_v35 = vpop.eup %893 }
 0x15d   :  { %v896_v36 = vpop.eup %895 }
 0x15e   :  { %v898_v37 = vpop.eup %897 }
 0x15f   :  { %v900_v38 = vpop.eup %899 }
 0x160   :  { %v902_v39 = vpop.eup %901 }
 0x161   :  { %v904_v40 = vpop.eup %903 }
 0x162   :  { %v906_v41 = vpop.eup %905 }
 0x163   :  { %v908_v43 = vpop.eup %907  ;;  %v138_v46 = vmul.f32 %v906_v41, %v894_v35  ;;  %v139_v47 = vmul.f32 %v906_v41, %v896_v36 }
 0x164   :  { %v910_v45 = vpop.eup %909  ;;  %v141_v48 = vmul.f32 %v908_v43, %v898_v37  ;;  %v142_v50 = vmul.f32 %v908_v43, %v900_v38 }
 0x165   :  { %v144_v51 = vmul.f32 %v910_v45, %v902_v39  ;;  %v145_v10 = vmul.f32 %v910_v45, %v904_v40  ;;  %v175_v52 = vsel %vm169_vm10, 0.0, %v138_v46  ;;  %v176_v53 = vsel %vm158_vm9, 0.0, %v139_v47 }
 0x166   :  { %v177_v54 = vsel %vm171_vm12, 0.0, %v141_v48  ;;  %v178_v55 = vsel %vm160_vm11, 0.0, %v142_v50  ;;  %v182_v58 = vsel %vm181_vm15, %v175_v52, 0.0  ;;  %v183_v59 = vsel %vm181_vm15, %v176_v53, 0.0 }
 0x167   :  { %v179_v56 = vsel %vm173_vm14, 0.0, %v144_v51  ;;  %v180_v57 = vsel %vm162_vm13, 0.0, %v145_v10  ;;  %v191_v60 = vsel %vm181_vm15, %v177_v54, 0.0  ;;  %v192_v61 = vsel %vm181_vm15, %v178_v55, 0.0 }
 0x168   :  { %v200_v62 = vsel %vm181_vm15, %v179_v56, 0.0  ;;  %v201_v63 = vsel %vm181_vm15, %v180_v57, 0.0  ;;  %v184_v0 = vadd.f32 %v183_v59, %v182_v58  ;;  %v193_v1 = vadd.f32 %v192_v61, %v191_v60  ;;  %v358_v59 = vld [vmem:[%s1205_s4 + $0x20] sm:$0xff]  ;;  %v359_v60 = vld [vmem:[%s1205_s4 + $0x28] sm:$0xff] }
 0x169   :  { %v202_v2 = vadd.f32 %v201_v63, %v200_v62  ;;  %v801_v61 = vpack.c.bf16 %v359_v60, %v358_v59  ;;  %v360_v62 = vld [vmem:[%s1205_s4 + $0x30] sm:$0xff]  ;;  %v361_v63 = vld [vmem:[%s1205_s4 + $0x38] sm:$0xff] }
 0x16a   :  { %v185_v3 = vrot.slane %v184_v0, 4  ;;  %v194_v4 = vrot.slane %v193_v1, 4 }
 0x16b   :  { %v203_v5 = vrot.slane %v202_v2, 4 }
 0x16c   :  { %v186_v6 = vadd.f32 %v185_v3, %v184_v0  ;;  %v195_v7 = vadd.f32 %v194_v4, %v193_v1  ;;  %v805_v0 = vpack.c.bf16 %v361_v63, %v360_v62  ;;  %v362_v1 = vld [vmem:[%s1205_s4 + $0x40] sm:$0xff]  ;;  %v364_v3 = vld [vmem:[%s1205_s4 + $0x50] sm:$0xff]  ;;  %v365_v4 = vld [vmem:[%s1205_s4 + $0x58] sm:$0xff] }
 0x16d   :  { %v204_v9 = vadd.f32 %v203_v5, %v202_v2  ;;  %v813_v5 = vpack.c.bf16 %v365_v4, %v364_v3 }
 0x16e   :  { %v187_v11 = vrot.slane %v186_v6, 2  ;;  %v196_v12 = vrot.slane %v195_v7, 2 }
 0x16f   :  { %v205_v13 = vrot.slane %v204_v9, 2 }
 0x170   :  { %v188_v14 = vadd.f32 %v187_v11, %v186_v6  ;;  %v197_v15 = vadd.f32 %v196_v12, %v195_v7  ;;  %v366_v6 = vld [vmem:[%s1205_s4 + $0x60] sm:$0xff]  ;;  %v367_v7 = vld [vmem:[%s1205_s4 + $0x68] sm:$0xff]  ;;  %v368_v11 = vld [vmem:[%s1205_s4 + $0x70] sm:$0xff] }
 0x171   :  { %v206_v16 = vadd.f32 %v205_v13, %v204_v9  ;;  %v817_v9 = vpack.c.bf16 %v367_v7, %v366_v6  ;;  %v369_v12 = vld [vmem:[%s1205_s4 + $0x78] sm:$0xff] }
 0x172   :  { %v189_v17 = vrot.slane %v188_v14, 1  ;;  %v198_v18 = vrot.slane %v197_v15, 1  ;;  %v821_v13 = vpack.c.bf16 %v369_v12, %v368_v11 }
 0x173   :  { %v207_v19 = vrot.slane %v206_v16, 1 }
 0x174   :  { %v190_v20 = vadd.f32 %v189_v17, %v188_v14  ;;  %v199_v21 = vadd.f32 %v198_v18, %v197_v15 }
 0x175   :  { %v208_v22 = vadd.f32 %v207_v19, %v206_v16  ;;  %v645_v19 = vld [vmem:[%s1205_s4 + $0x80] sm:$0xff] }
 0x176   :  { %v209_v23 = vadd.f32 1e-08, %v190_v20  ;;  %v210_v24 = vadd.f32 1e-08, %v199_v21  ;;  %v646_v20 = vld [vmem:[%s1205_s4 + $0x88] sm:$0xff] }
 0x177   :  { %v211_v25 = vadd.f32 1e-08, %v208_v22 }
 0x178   :  { %911 = vrcp.f32 %v209_v23  ;;  %v829_v23 = vpack.c.bf16 %v646_v20, %v645_v19 }
 0x179   :  { %913 = vrcp.f32 %v210_v24  ;;  %v647_v24 = vld [vmem:[%s1205_s4 + $0x90] sm:$0xff] }
 0x17a   :  { %915 = vrcp.f32 %v211_v25  ;;  %v648_v25 = vld [vmem:[%s1205_s4 + $0x98] sm:$0xff] }
 0x182   :  { %v912_v26 = vpop.eup %911 }
 0x183   :  { %v914_v27 = vpop.eup %913  ;;  %v213_v31 = vmul.f32 %v912_v26, %v175_v52  ;;  %v214_v32 = vmul.f32 %v912_v26, %v176_v53  ;;  %v357_v53 = vld [vmem:[%s1205_s4 + $0x18] sm:$0xff]  ;;  %v833_v26 = vpack.c.bf16 %v648_v25, %v647_v24 }
 0x184   :  { %v916_v28 = vpop.eup %915  ;;  %v216_v33 = vmul.f32 %v914_v27, %v177_v54  ;;  %v217_v34 = vmul.f32 %v914_v27, %v178_v55  ;;  %v649_v27 = vld [vmem:[%s1205_s4 + $0xa0] sm:$0xff] }
 0x185   :  { %v219_v36 = vmul.f32 %v916_v28, %v179_v56  ;;  %v220_v37 = vmul.f32 %v916_v28, %v180_v57  ;;  %v650_v28 = vld [vmem:[%s1205_s4 + $0xa8] sm:$0xff] }
 0x1b0   :  { %v240_v35 = vpop.permute.xlu1 %239 }
 0x1b1   :  { %v244_v38 = vrot.slane %v240_v35, %v1007_v42  ;;  %v248_v39 = vrot.slane %v240_v35, %v247_v29  ;;  %v252_v40 = vrot.slane %v240_v35, %v251_v30  ;;  %v356_v42 = vld [vmem:[%s1205_s4 + $0x10] sm:$0xff]  ;;  %v837_v29 = vpack.c.bf16 %v650_v28, %v649_v27 }
 0x1b2   :  { %v797_v58 = vpack.c.bf16 %v357_v53, %v356_v42  ;;  %v651_v30 = vld [vmem:[%s1205_s4 + $0xb0] sm:$0xff] }
 0x1b3   :  { %v253_v41 = vmul.f32 %v244_v38, %v213_v31  ;;  %v254_v43 = vmul.f32 %v244_v38, %v214_v32  ;;  %v255_v44 = vmul.f32 %v248_v39, %v216_v33  ;;  %v256_v45 = vmul.f32 %v248_v39, %v217_v34  ;;  %v652_v31 = vld [vmem:[%s1205_s4 + $0xb8] sm:$0xff]  ;;  %v653_v33 = vld [vmem:[%s1205_s4 + $0xc0] sm:$0xff]  ;;  %v654_v34 = vld [vmem:[%s1205_s4 + $0xc8] sm:$0xff] }
 0x1b4   :  { %v257_v46 = vmul.f32 %v252_v40, %v219_v36  ;;  %v258_v47 = vmul.f32 %v252_v40, %v220_v37  ;;  %v841_v32 = vpack.c.bf16 %v652_v31, %v651_v30  ;;  %v845_v35 = vpack.c.bf16 %v654_v34, %v653_v33  ;;  %v655_v36 = vld [vmem:[%s1205_s4 + $0xd0] sm:$0xff]  ;;  %v656_v37 = vld [vmem:[%s1205_s4 + $0xd8] sm:$0xff]  ;;  %v657_v39 = vld [vmem:[%s1205_s4 + $0xe0] sm:$0xff] }
 0x1b5   :  { %v259_v48 = vsel %vm181_vm15, %v253_v41, 0.0  ;;  %v260_v8 = vsel %vm181_vm15, %v255_v44, 0.0  ;;  %v264_v50 = vsel %vm181_vm15, %v254_v43, 0.0  ;;  %v265_v51 = vsel %vm181_vm15, %v256_v45, 0.0  ;;  %v658_v40 = vld [vmem:[%s1205_s4 + $0xe8] sm:$0xff]  ;;  %v659_v43 = vld [vmem:[%s1205_s4 + $0xf0] sm:$0xff] }
 0x1b6   :  { %v266_v10 = vadd.f32 %v265_v51, %v264_v50  ;;  %v261_v52 = vadd.f32 %v260_v8, %v259_v48  ;;  %v267_v54 = vsel %vm181_vm15, %v258_v47, 0.0  ;;  %v262_v55 = vsel %vm181_vm15, %v257_v46, 0.0  ;;  %v660_v44 = vld [vmem:[%s1205_s4 + $0xf8] sm:$0xff] }
 0x1b7   :  { %v849_v38 = vpack.c.bf16 %v656_v37, %v655_v36  ;;  %v853_v41 = vpack.c.bf16 %v658_v40, %v657_v39  ;;  %v857_v45 = vpack.c.bf16 %v660_v44, %v659_v43 }
 0x1b8   :  { %v268_v56 = vadd.f32 %v267_v54, %v266_v10  ;;  %v263_v57 = vadd.f32 %v262_v55, %v261_v52 }
 0x1ba   :  { %270 = vst.msk [vmem:[#allocation2 + $0x8] sm:$0xff] %vm181_vm15, %v268_v56  ;;  %709 = vmatprep.mubr.msk.f32.mxu1 %vm181_vm15, %v263_v57  ;;  %269 = vst.msk [vmem:[#allocation2] sm:$0xff] %vm181_vm15, %v263_v57  ;;  %751 = vmatprep.mubr.msk.f32.mxu0 %vm181_vm15, %v263_v57 }
 0x1bb   :  { %710 = vmatmul.mubr.msk.f32.vlgmr.msra.gmra.mrb[0].mxu1 %vm181_vm15, %v268_v56 }
 0x1bc   :  { %796 = vmatpush3.bf16.msra.mxu1 %v1016_v49  ;;  %v363_v49 = vld [vmem:[%s1205_s4 + $0x48] sm:$0xff] }
 0x1bd   :  { %798 = vmatprep.subr.bf16.mxu1 %v797_v58  ;;  %v809_v2 = vpack.c.bf16 %v363_v49, %v362_v1 }
 0x1c0   :  { %800 = vmatpush3.bf16.msra.mxu1 %v797_v58 }
 0x1c1   :  { %802 = vmatprep.subr.bf16.mxu1 %v801_v61 }
 0x1c4   :  { %804 = vmatpush3.bf16.msra.mxu1 %v801_v61 }
 0x1c5   :  { %806 = vmatprep.subr.bf16.mxu1 %v805_v0 }
 0x1c8   :  { %808 = vmatpush3.bf16.msra.mxu1 %v805_v0 }
 0x1c9   :  { %810 = vmatprep.subr.bf16.mxu1 %v809_v2 }
 0x1cc   :  { %812 = vmatpush3.bf16.msra.mxu1 %v809_v2 }
 0x1cd   :  { %814 = vmatprep.subr.bf16.mxu1 %v813_v5 }
 0x1d0   :  { %816 = vmatpush3.bf16.msra.mxu1 %v813_v5 }
 0x1d1   :  { %818 = vmatprep.subr.bf16.mxu1 %v817_v9 }
 0x1d4   :  { %820 = vmatpush3.bf16.msra.mxu1 %v817_v9 }
 0x1d5   :  { %822 = vmatprep.subr.bf16.mxu1 %v821_v13 }
 0x1d8   :  { %824 = vmatpush3.bf16.msra.mxu1 %v821_v13 }
 0x28e   :  { %v711_v14 = vpop.f32.mrb[0].mxu1 }
 0x28f   :  { %v345_v15 = vpop.f32.mrb[1].mxu1 }
 0x290   :  { %744 = vmatprep.mubr.f32.mxu1 %v345_v15 }
 0x291   :  { %745 = vmatmul.mubr.f32.vlgmr.msra.gmra.mrb[2].mxu1 %v711_v14 }
 0x364   :  { %v746_v16 = vpop.f32.mrb[2].mxu1 }
 0x365   :  { %v446_v17 = vmax.f32 %v746_v16, 0.0  ;;  %v436_v18 = vpop.f32.mrb[3].mxu1 }
 0x366   :  { %v445_v21 = vmax.f32 %v436_v18, 0.0 }
 0x368   :  { %v825_v22 = vpack.c.bf16 %v446_v17, %v445_v21 }
 0x36a   :  { %826 = vmatprep.subr.bf16.mxu0 %v825_v22 }
 0x36b   :  { %828 = vmatpush3.bf16.msra.mxu0 %v825_v22 }
 0x36c   :  { %830 = vmatprep.subr.bf16.mxu0 %v829_v23 }
 0x36e   :  { %752 = vmatmul.mubr.msk.f32.vlgmr.msra.gmra.mrb[0].mxu0 %vm181_vm15, %v268_v56 }
 0x36f   :  { %832 = vmatpush3.bf16.msra.mxu0 %v829_v23 }
 0x370   :  { %834 = vmatprep.subr.bf16.mxu0 %v833_v26 }
 0x373   :  { %836 = vmatpush3.bf16.msra.mxu0 %v833_v26 }
 0x374   :  { %838 = vmatprep.subr.bf16.mxu0 %v837_v29 }
 0x377   :  { %840 = vmatpush3.bf16.msra.mxu0 %v837_v29 }
 0x378   :  { %842 = vmatprep.subr.bf16.mxu0 %v841_v32 }
 0x37b   :  { %844 = vmatpush3.bf16.msra.mxu0 %v841_v32 }
 0x37c   :  { %846 = vmatprep.subr.bf16.mxu0 %v845_v35 }
 0x37f   :  { %848 = vmatpush3.bf16.msra.mxu0 %v845_v35 }
 0x380   :  { %850 = vmatprep.subr.bf16.mxu0 %v849_v38 }
 0x383   :  { %852 = vmatpush3.bf16.msra.mxu0 %v849_v38 }
 0x384   :  { %854 = vmatprep.subr.bf16.mxu0 %v853_v41 }
 0x387   :  { %856 = vmatpush3.bf16.msra.mxu0 %v853_v41 }
 0x388   :  { %858 = vmatprep.subr.bf16.mxu0 %v857_v45 }
 0x38b   :  { %860 = vmatpush3.bf16.msra.mxu0 %v857_v45 }
 0x441   :  { %v753_v46 = vpop.f32.mrb[0].mxu0 }
 0x442   :  { %v513_v47 = vpop.f32.mrb[1].mxu0 }
 0x443   :  { %786 = vmatprep.mubr.f32.mxu0 %v513_v47 }
 0x444   :  { %787 = vmatmul.mubr.f32.vlgmr.msra.gmra.mrb[2].mxu0 %v753_v46 }
 0x445   :  { %928 = shalt.err (!%p925_p4)
}
 0x446   :  { %s929_s1 = scalar_lea.hbm %s1207_s6, 256 }
 0x447   :  { %p930_p5 = scmp.ne.s32.totalorder %s1207_s6, %s929_s1  ;;  %p933_p6 = scmp.lt.u32.totalorder %s929_s1, %s1207_s6 }
 0x449   :  { %p935_p7 = pnand %p933_p6, %p930_p5 }
 0x44b   :  { %938 = shalt.err (!%p935_p7)
}
 0x44c   :  { %s943_s8 = smov 128   ;;  %s944_s9 = smov 8  }
 0x44d   :  { %631 = dma.vmem_to_hbm [thread:$0]  %s626_s25, 256, %s1207_s6, [#allocation3], %s943_s8, %s943_s8, %s944_s9  }
 0x517   :  { %v788_v48 = vpop.f32.mrb[2].mxu0 }
 0x518   :  { %v615_v8 = vmax.f32 %v788_v48, 0.0  ;;  %v605_v50 = vpop.f32.mrb[3].mxu0 }
 0x519   :  { %v614_v51 = vmax.f32 %v605_v50, 0.0 }
 0x51a   :  { %617 = vst [vmem:[%s1206_s5 + $0x8] sm:$0xff] %v615_v8 }
 0x51b   :  { %616 = vst [vmem:[%s1206_s5] sm:$0xff] %v614_v51 }
 0x51c   :  { %939 = dma.done.wait [#allocation3], 256  }
 0x51d   :  { %940 = vsyncadd [#allocation3], 4294967040 }
 0x51e   :  { %637 = vsyncpa [#allocation3], 1 }

</bundles_post_ra>
